<compile_context>
chip_gen: v7x
topology: tpu7x:2x2x1
jax: 0.10.0
libtpu: 0.0.40
codegen_flags: <defaults>
</compile_context>

<pallas_src>
import jax
import jax.numpy as jnp
from jax.experimental import pallas as pl
from jax.experimental.pallas import tpu as pltpu

# ----------------------------- model config ---------------------------------
NUM_FEATURES = 3
NUM_USERS = 10          # N
NUM_CHANNELS = 5        # K
HIDDEN_DIM = 32         # small hidden dim for the synthetic example
BATCH = 2

INPUT_DIM = NUM_USERS * NUM_CHANNELS * NUM_FEATURES      # N*K*F = 150
OUTPUT_DIM = NUM_USERS * NUM_CHANNELS                     # N*K   = 50

# layer dims: in -> h -> 2h -> 4h -> 2h -> h -> N*K
LAYER_DIMS = [
    (INPUT_DIM, HIDDEN_DIM),
    (HIDDEN_DIM, HIDDEN_DIM * 2),
    (HIDDEN_DIM * 2, HIDDEN_DIM * 4),
    (HIDDEN_DIM * 4, HIDDEN_DIM * 2),
    (HIDDEN_DIM * 2, HIDDEN_DIM),
    (HIDDEN_DIM, OUTPUT_DIM),
]
NUM_LAYERS = len(LAYER_DIMS)


def _round_up(x, m):
    return ((x + m - 1) // m) * m


# Padded, uniform slab geometry (bf16-friendly: K dims multiples of 16,
# N dims a full 128-lane tile).  Do NOT pad to 256: that would only add
# all-zero MXU passes on v5e/v6e/v7x.
IN_PAD = _round_up(INPUT_DIM, 16)                 # 160 (first-layer K dim)
OUT_PAD = 128                                     # every layer's padded N dim
HIDDEN_PAD = 128                                  # padded K dim for layers 2..6
assert all(dout <= OUT_PAD for (_, dout) in LAYER_DIMS)
assert all(din <= HIDDEN_PAD for (din, _) in LAYER_DIMS[1:])

NEG_FILL = -1e30   # finite Python-float stand-in for -inf (avoids NaN rows)


# ------------------------------- kernel -------------------------------------
def fcnn_kernel(x_ref, maskbias_ref, w_ref, b_ref, out_ref):
    """Full MLP + mask + softmax on one VMEM-resident batch tile.

    x_ref       : (TB, IN_PAD)              bf16   zero-padded flattened states
    maskbias_ref: (TB, OUT_PAD)             f32    0.0 keep / -1e30 masked (incl. padding)
    w_ref       : (6, IN_PAD, OUT_PAD)      bf16   zero-padded weight slab
    b_ref       : (6, 1, OUT_PAD)           f32    zero-padded bias slab
    out_ref     : (TB, OUT_PAD)             f32    softmax probabilities
    """
    # Layer 1: (TB, IN_PAD) @ (IN_PAD, OUT_PAD), f32 MXU accumulation.
    h = jnp.dot(x_ref[...], w_ref[0],
                preferred_element_type=jnp.float32) + b_ref[0]
    h = jnp.maximum(h, 0.0)

    # Layers 2..6: activations live in the padded 128-wide space; padded
    # weight rows/cols are zero so padding is mathematically inert.
    # Elementwise math stays f32 (v5e has no bf16 VALU); LHS is cast to bf16
    # only for the MXU.
    for i in range(1, NUM_LAYERS):
        w = w_ref[i, :HIDDEN_PAD, :]                       # (128, 128) bf16
        h = jnp.dot(h.astype(jnp.bfloat16), w,
                    preferred_element_type=jnp.float32) + b_ref[i]
        if i < NUM_LAYERS - 1:
            h = jnp.maximum(h, 0.0)

    # masked_fill as an additive bias: padded output columns / padded batch
    # rows carry -1e30 too, so they do not perturb the softmax over the real
    # 50 logits.
    masked = h + maskbias_ref[...]

    # softmax along dim=1 (numerically stabilized, exact normalization)
    m = jnp.max(masked, axis=1, keepdims=True)
    e = jnp.exp(masked - m)
    denom = jnp.sum(e, axis=1, keepdims=True)
    out_ref[...] = e / denom


# ------------------------------- wrapper -------------------------------------
def pack_params(params):
    """Pack per-layer (W, b) into one padded bf16 weight slab + f32 bias slab."""
    w_slab = jnp.zeros((NUM_LAYERS, IN_PAD, OUT_PAD), jnp.float32)
    b_slab = jnp.zeros((NUM_LAYERS, 1, OUT_PAD), jnp.float32)
    for i, (w, b) in enumerate(params):
        din, dout = w.shape
        w_slab = w_slab.at[i, :din, :dout].set(w)
        b_slab = b_slab.at[i, 0, :dout].set(b.reshape(-1))
    return w_slab.astype(jnp.bfloat16), b_slab


def _choose_batch_tile(b):
    """bf16-friendly batch tile: multiple of 16; one block when it fits,
    otherwise 512 so large batches give >=2 'parallel' grid steps (v7x)."""
    b16 = _round_up(max(b, 1), 16)
    return b16 if b16 <= 512 else 512


def fcnn_forward(state, mask, w_slab, b_slab):
    """state: (B, N, K, F) f32; mask: (B, N*K) int (nonzero => masked)."""
    b = state.shape[0]
    x = state.reshape(b, -1).astype(jnp.float32)             # nn.Flatten()

    tb = _choose_batch_tile(b)
    b_pad = _round_up(b, tb)

    # Zero-padded, lane/sublane-aligned inputs.
    x_pad = jnp.zeros((b_pad, IN_PAD), jnp.float32)
    x_pad = x_pad.at[:b, :INPUT_DIM].set(x).astype(jnp.bfloat16)

    # Additive mask bias: padded rows/cols are "masked" (-1e30).
    mask_bias = jnp.full((b_pad, OUT_PAD), NEG_FILL, jnp.float32)
    real_bias = jnp.where(mask != 0, jnp.float32(NEG_FILL), jnp.float32(0.0))
    mask_bias = mask_bias.at[:b, :OUTPUT_DIM].set(real_bias)

    grid_spec = pltpu.PrefetchScalarGridSpec(
        num_scalar_prefetch=0,
        grid=(b_pad // tb,),
        in_specs=[
            pl.BlockSpec((tb, IN_PAD), lambda i: (i, 0)),
            pl.BlockSpec((tb, OUT_PAD), lambda i: (i, 0)),
            pl.BlockSpec((NUM_LAYERS, IN_PAD, OUT_PAD), lambda i: (0, 0, 0)),
            pl.BlockSpec((NUM_LAYERS, 1, OUT_PAD), lambda i: (0, 0, 0)),
        ],
        out_specs=pl.BlockSpec((tb, OUT_PAD), lambda i: (i, 0)),
    )

    out_pad = pl.pallas_call(
        fcnn_kernel,
        out_shape=jax.ShapeDtypeStruct((b_pad, OUT_PAD), jnp.float32),
        grid_spec=grid_spec,
        compiler_params=pltpu.CompilerParams(
            dimension_semantics=("parallel",)),
    )(x_pad, mask_bias, w_slab, b_slab)

    return out_pad[:b, :OUTPUT_DIM]


# -------------------------- parameter construction ---------------------------
def init_params(key):
    params = []
    for (din, dout) in LAYER_DIMS:
        key, kw, kb = jax.random.split(key, 3)
        bound = 1.0 / jnp.sqrt(jnp.float32(din))  # mimic PyTorch Linear init range
        w = jax.random.uniform(kw, (din, dout), jnp.float32, -bound, bound)
        bias = jax.random.uniform(kb, (1, dout), jnp.float32, -bound, bound)
        params.append((w, bias))
    return params


def get_mask(state):
    # TODO(synk): `get_mask` is not defined in the reference source; this is a
    # deterministic stand-in: mask (user, channel) slots whose first feature > 0.5.
    m = state[..., 0] > 0.5                                   # (B, N, K) bool
    return m.reshape(state.shape[0], -1).astype(jnp.int32)    # (B, N*K)


# ------------------------------ pure-JAX ref ---------------------------------
def fcnn_ref(state, mask, params):
    """Mirrors the kernel's bf16-matmul / f32-accumulate arithmetic."""
    h = state.reshape(state.shape[0], -1).astype(jnp.float32)
    for i, (w, bias) in enumerate(params):
        h = jnp.dot(h.astype(jnp.bfloat16), w.astype(jnp.bfloat16),
                    preferred_element_type=jnp.float32) + bias
        if i < len(params) - 1:
            h = jnp.maximum(h, 0.0)
    h = jnp.where(mask != 0, jnp.float32(NEG_FILL), h)
    return jax.nn.softmax(h, axis=1)


# --------------------------------- main --------------------------------------
if __name__ == "__main__":
    key = jax.random.PRNGKey(0)
    key, k_state, k_params = jax.random.split(key, 3)

    state = jax.random.uniform(
        k_state, (BATCH, NUM_USERS, NUM_CHANNELS, NUM_FEATURES), jnp.float32)
    params = init_params(k_params)
    mask = get_mask(state)

    w_slab, b_slab = pack_params(params)
    out = fcnn_forward(state, mask, w_slab, b_slab)
    out = jax.block_until_ready(out)

    ref = fcnn_ref(state, mask, params)
    assert out.shape == (BATCH, OUTPUT_DIM)
    assert jnp.allclose(out, ref, atol=1e-2, rtol=1e-2), "mismatch vs JAX reference"
    # each row of the softmax output should sum to 1
    assert jnp.allclose(jnp.sum(out, axis=1), jnp.ones((BATCH,)), atol=1e-3)

    print("KERNEL_OK")
</pallas_src>

<mosaic_0001>
module attributes {stable_mosaic.version = 11 : i64} {
  func.func @fcnn_kernel(%arg0: i32, %arg1: memref<16x160xbf16, #tpu.memory_space<vmem>>, %arg2: memref<16x128xf32, #tpu.memory_space<vmem>>, %arg3: memref<6x160x128xbf16, #tpu.memory_space<vmem>>, %arg4: memref<6x1x128xf32, #tpu.memory_space<vmem>>, %arg5: memref<16x128xf32, #tpu.memory_space<vmem>>) attributes {dimension_semantics = [#tpu.dimension_semantics<parallel>], iteration_bounds = array<i64: 1>, scalar_prefetch = 0 : i64, scratch_operands = 0 : i64, tpu.core_type = #tpu.core_type<tc>, window_params = [{transform_indices = @transform_0, window_bounds = array<i64: 16, 160>}, {transform_indices = @transform_1, window_bounds = array<i64: 16, 128>}, {pipeline_mode = #tpu.pipeline_mode<synchronous>, transform_indices = @transform_2, window_bounds = array<i64: 6, 160, 128>}, {pipeline_mode = #tpu.pipeline_mode<synchronous>, transform_indices = @transform_3, window_bounds = array<i64: 6, 1, 128>}, {transform_indices = @transform_4, window_bounds = array<i64: 16, 128>}]} {
    %c0 = arith.constant 0 : index
    %c0_0 = arith.constant 0 : index
    %0 = vector.load %arg1[%c0, %c0_0] : memref<16x160xbf16, #tpu.memory_space<vmem>>, vector<16x160xbf16>
    %c0_1 = arith.constant 0 : index
    %c0_2 = arith.constant 0 : index
    %c0_3 = arith.constant 0 : index
    %1 = vector.load %arg3[%c0_1, %c0_2, %c0_3] : memref<6x160x128xbf16, #tpu.memory_space<vmem>>, vector<1x160x128xbf16>
    %2 = vector.shape_cast %1 : vector<1x160x128xbf16> to vector<160x128xbf16>
    %cst = arith.constant dense<0.000000e+00> : vector<16x128xf32>
    %3 = tpu.matmul %0, %2, %cst {dimension_numbers = #tpu.dot_dimension_numbers<[1], [0], [0], [1], [0, 0, 1, 1], [], []>} : vector<16x160xbf16>, vector<160x128xbf16>, vector<16x128xf32> -> vector<16x128xf32>
    %c0_4 = arith.constant 0 : index
    %c0_5 = arith.constant 0 : index
    %c0_6 = arith.constant 0 : index
    %4 = vector.load %arg4[%c0_4, %c0_5, %c0_6] : memref<6x1x128xf32, #tpu.memory_space<vmem>>, vector<1x1x128xf32>
    %5 = vector.shape_cast %4 : vector<1x1x128xf32> to vector<1x128xf32>
    %6 = vector.broadcast %5 : vector<1x128xf32> to vector<16x128xf32>
    %7 = arith.addf %3, %6 : vector<16x128xf32>
    %cst_7 = arith.constant 0.000000e+00 : f32
    %8 = vector.broadcast %cst_7 : f32 to vector<16x128xf32>
    %9 = arith.maximumf %7, %8 : vector<16x128xf32>
    %c1 = arith.constant 1 : index
    %c0_8 = arith.constant 0 : index
    %c0_9 = arith.constant 0 : index
    %10 = vector.load %arg3[%c1, %c0_8, %c0_9] : memref<6x160x128xbf16, #tpu.memory_space<vmem>>, vector<1x128x128xbf16>
    %11 = vector.shape_cast %10 : vector<1x128x128xbf16> to vector<128x128xbf16>
    %12 = arith.truncf %9 : vector<16x128xf32> to vector<16x128xbf16>
    %cst_10 = arith.constant dense<0.000000e+00> : vector<16x128xf32>
    %13 = tpu.matmul %12, %11, %cst_10 {dimension_numbers = #tpu.dot_dimension_numbers<[1], [0], [0], [1], [0, 0, 1, 1], [], []>} : vector<16x128xbf16>, vector<128x128xbf16>, vector<16x128xf32> -> vector<16x128xf32>
    %c1_11 = arith.constant 1 : index
    %c0_12 = arith.constant 0 : index
    %c0_13 = arith.constant 0 : index
    %14 = vector.load %arg4[%c1_11, %c0_12, %c0_13] : memref<6x1x128xf32, #tpu.memory_space<vmem>>, vector<1x1x128xf32>
    %15 = vector.shape_cast %14 : vector<1x1x128xf32> to vector<1x128xf32>
    %16 = vector.broadcast %15 : vector<1x128xf32> to vector<16x128xf32>
    %17 = arith.addf %13, %16 : vector<16x128xf32>
    %cst_14 = arith.constant 0.000000e+00 : f32
    %18 = vector.broadcast %cst_14 : f32 to vector<16x128xf32>
    %19 = arith.maximumf %17, %18 : vector<16x128xf32>
    %c2 = arith.constant 2 : index
    %c0_15 = arith.constant 0 : index
    %c0_16 = arith.constant 0 : index
    %20 = vector.load %arg3[%c2, %c0_15, %c0_16] : memref<6x160x128xbf16, #tpu.memory_space<vmem>>, vector<1x128x128xbf16>
    %21 = vector.shape_cast %20 : vector<1x128x128xbf16> to vector<128x128xbf16>
    %22 = arith.truncf %19 : vector<16x128xf32> to vector<16x128xbf16>
    %cst_17 = arith.constant dense<0.000000e+00> : vector<16x128xf32>
    %23 = tpu.matmul %22, %21, %cst_17 {dimension_numbers = #tpu.dot_dimension_numbers<[1], [0], [0], [1], [0, 0, 1, 1], [], []>} : vector<16x128xbf16>, vector<128x128xbf16>, vector<16x128xf32> -> vector<16x128xf32>
    %c2_18 = arith.constant 2 : index
    %c0_19 = arith.constant 0 : index
    %c0_20 = arith.constant 0 : index
    %24 = vector.load %arg4[%c2_18, %c0_19, %c0_20] : memref<6x1x128xf32, #tpu.memory_space<vmem>>, vector<1x1x128xf32>
    %25 = vector.shape_cast %24 : vector<1x1x128xf32> to vector<1x128xf32>
    %26 = vector.broadcast %25 : vector<1x128xf32> to vector<16x128xf32>
    %27 = arith.addf %23, %26 : vector<16x128xf32>
    %cst_21 = arith.constant 0.000000e+00 : f32
    %28 = vector.broadcast %cst_21 : f32 to vector<16x128xf32>
    %29 = arith.maximumf %27, %28 : vector<16x128xf32>
    %c3 = arith.constant 3 : index
    %c0_22 = arith.constant 0 : index
    %c0_23 = arith.constant 0 : index
    %30 = vector.load %arg3[%c3, %c0_22, %c0_23] : memref<6x160x128xbf16, #tpu.memory_space<vmem>>, vector<1x128x128xbf16>
    %31 = vector.shape_cast %30 : vector<1x128x128xbf16> to vector<128x128xbf16>
    %32 = arith.truncf %29 : vector<16x128xf32> to vector<16x128xbf16>
    %cst_24 = arith.constant dense<0.000000e+00> : vector<16x128xf32>
    %33 = tpu.matmul %32, %31, %cst_24 {dimension_numbers = #tpu.dot_dimension_numbers<[1], [0], [0], [1], [0, 0, 1, 1], [], []>} : vector<16x128xbf16>, vector<128x128xbf16>, vector<16x128xf32> -> vector<16x128xf32>
    %c3_25 = arith.constant 3 : index
    %c0_26 = arith.constant 0 : index
    %c0_27 = arith.constant 0 : index
    %34 = vector.load %arg4[%c3_25, %c0_26, %c0_27] : memref<6x1x128xf32, #tpu.memory_space<vmem>>, vector<1x1x128xf32>
    %35 = vector.shape_cast %34 : vector<1x1x128xf32> to vector<1x128xf32>
    %36 = vector.broadcast %35 : vector<1x128xf32> to vector<16x128xf32>
    %37 = arith.addf %33, %36 : vector<16x128xf32>
    %cst_28 = arith.constant 0.000000e+00 : f32
    %38 = vector.broadcast %cst_28 : f32 to vector<16x128xf32>
    %39 = arith.maximumf %37, %38 : vector<16x128xf32>
    %c4 = arith.constant 4 : index
    %c0_29 = arith.constant 0 : index
    %c0_30 = arith.constant 0 : index
    %40 = vector.load %arg3[%c4, %c0_29, %c0_30] : memref<6x160x128xbf16, #tpu.memory_space<vmem>>, vector<1x128x128xbf16>
    %41 = vector.shape_cast %40 : vector<1x128x128xbf16> to vector<128x128xbf16>
    %42 = arith.truncf %39 : vector<16x128xf32> to vector<16x128xbf16>
    %cst_31 = arith.constant dense<0.000000e+00> : vector<16x128xf32>
    %43 = tpu.matmul %42, %41, %cst_31 {dimension_numbers = #tpu.dot_dimension_numbers<[1], [0], [0], [1], [0, 0, 1, 1], [], []>} : vector<16x128xbf16>, vector<128x128xbf16>, vector<16x128xf32> -> vector<16x128xf32>
    %c4_32 = arith.constant 4 : index
    %c0_33 = arith.constant 0 : index
    %c0_34 = arith.constant 0 : index
    %44 = vector.load %arg4[%c4_32, %c0_33, %c0_34] : memref<6x1x128xf32, #tpu.memory_space<vmem>>, vector<1x1x128xf32>
    %45 = vector.shape_cast %44 : vector<1x1x128xf32> to vector<1x128xf32>
    %46 = vector.broadcast %45 : vector<1x128xf32> to vector<16x128xf32>
    %47 = arith.addf %43, %46 : vector<16x128xf32>
    %cst_35 = arith.constant 0.000000e+00 : f32
    %48 = vector.broadcast %cst_35 : f32 to vector<16x128xf32>
    %49 = arith.maximumf %47, %48 : vector<16x128xf32>
    %c5 = arith.constant 5 : index
    %c0_36 = arith.constant 0 : index
    %c0_37 = arith.constant 0 : index
    %50 = vector.load %arg3[%c5, %c0_36, %c0_37] : memref<6x160x128xbf16, #tpu.memory_space<vmem>>, vector<1x128x128xbf16>
    %51 = vector.shape_cast %50 : vector<1x128x128xbf16> to vector<128x128xbf16>
    %52 = arith.truncf %49 : vector<16x128xf32> to vector<16x128xbf16>
    %cst_38 = arith.constant dense<0.000000e+00> : vector<16x128xf32>
    %53 = tpu.matmul %52, %51, %cst_38 {dimension_numbers = #tpu.dot_dimension_numbers<[1], [0], [0], [1], [0, 0, 1, 1], [], []>} : vector<16x128xbf16>, vector<128x128xbf16>, vector<16x128xf32> -> vector<16x128xf32>
    %c5_39 = arith.constant 5 : index
    %c0_40 = arith.constant 0 : index
    %c0_41 = arith.constant 0 : index
    %54 = vector.load %arg4[%c5_39, %c0_40, %c0_41] : memref<6x1x128xf32, #tpu.memory_space<vmem>>, vector<1x1x128xf32>
    %55 = vector.shape_cast %54 : vector<1x1x128xf32> to vector<1x128xf32>
    %56 = vector.broadcast %55 : vector<1x128xf32> to vector<16x128xf32>
    %57 = arith.addf %53, %56 : vector<16x128xf32>
    %c0_42 = arith.constant 0 : index
    %c0_43 = arith.constant 0 : index
    %58 = vector.load %arg2[%c0_42, %c0_43] : memref<16x128xf32, #tpu.memory_space<vmem>>, vector<16x128xf32>
    %59 = arith.addf %57, %58 : vector<16x128xf32>
    %cst_44 = arith.constant dense<0xFF800000> : vector<16xf32>
    %60 = vector.multi_reduction <maximumf>, %59, %cst_44 [1] : vector<16x128xf32> to vector<16xf32>
    %61 = vector.shape_cast %60 : vector<16xf32> to vector<16x1xf32>
    %62 = vector.broadcast %61 : vector<16x1xf32> to vector<16x128xf32>
    %63 = arith.subf %59, %62 : vector<16x128xf32>
    %64 = math.exp %63 : vector<16x128xf32>
    %cst_45 = arith.constant dense<0.000000e+00> : vector<16xf32>
    %65 = vector.multi_reduction <add>, %64, %cst_45 [1] : vector<16x128xf32> to vector<16xf32>
    %66 = vector.shape_cast %65 : vector<16xf32> to vector<16x1xf32>
    %67 = vector.broadcast %66 : vector<16x1xf32> to vector<16x128xf32>
    %68 = arith.divf %64, %67 : vector<16x128xf32>
    %c0_46 = arith.constant 0 : index
    %c0_47 = arith.constant 0 : index
    %69 = vector.load %arg5[%c0_46, %c0_47] : memref<16x128xf32, #tpu.memory_space<vmem>>, vector<16x128xf32>
    tpu.vector_store %arg5[%c0_46, %c0_47], %68 {strides = array<i32>} : memref<16x128xf32, #tpu.memory_space<vmem>>, vector<16x128xf32>,
    return
  }
  func.func @transform_0(%arg0: i32) -> (i32, i32) {
    %c0_i32 = arith.constant 0 : i32
    %c0_i32_0 = arith.constant 0 : i32
    return %arg0, %c0_i32 : i32, i32
  }
  func.func @transform_1(%arg0: i32) -> (i32, i32) {
    %c0_i32 = arith.constant 0 : i32
    %c0_i32_0 = arith.constant 0 : i32
    return %arg0, %c0_i32 : i32, i32
  }
  func.func @transform_2(%arg0: i32) -> (i32, i32, i32) {
    %c0_i32 = arith.constant 0 : i32
    %c0_i32_0 = arith.constant 0 : i32
    %c0_i32_1 = arith.constant 0 : i32
    %c0_i32_2 = arith.constant 0 : i32
    return %c0_i32, %c0_i32_0, %c0_i32_1 : i32, i32, i32
  }
  func.func @transform_3(%arg0: i32) -> (i32, i32, i32) {
    %c0_i32 = arith.constant 0 : i32
    %c0_i32_0 = arith.constant 0 : i32
    %c0_i32_1 = arith.constant 0 : i32
    %c0_i32_2 = arith.constant 0 : i32
    return %c0_i32, %c0_i32_0, %c0_i32_1 : i32, i32, i32
  }
  func.func @transform_4(%arg0: i32) -> (i32, i32) {
    %c0_i32 = arith.constant 0 : i32
    %c0_i32_0 = arith.constant 0 : i32
    return %arg0, %c0_i32 : i32, i32
  }
}

</mosaic_0001>

<bundles_post_ra>
// kernel: tpu_custom_call.1
= control target key start
LH: loop header
LB: loop body
LE: loop exit
PB: predicated region body
PF: predicated region fallthrough
CT: control target
= control target key end

     0   :  { %9 = vsyncpa [#allocation3], 0  ;;  %s1373_s0 = inlined_call_operand.hbm [shape: bf16[16,160], index: 0, kind: input, shape index: {}]   ;;  %s1374_s1 = inlined_call_operand.hbm [shape: f32[16,128], index: 1, kind: input, shape index: {}]   ;;  %s1375_s2 = inlined_call_operand.hbm [shape: bf16[6,160,128], index: 2, kind: input, shape index: {}]   ;;  %s1376_s3 = inlined_call_operand.vmem [shape: f32[6,1,128], index: 3, kind: input, shape index: {}]   ;;  %s1377_s4 = inlined_call_operand.hbm [shape: f32[16,128], index: 4, kind: output, shape index: {}]  }
   0x1   :  { %10 = vsyncpa [#allocation6], 0 }
   0x2   :  { %11 = vsyncpa [#allocation4], 0  ;;  %s1205_s15 = smov [#allocation5]   ;;  %s1206_s17 = smov [#allocation2]  }
   0x3   :  { %s29_s16 = sshll.u32 %s1205_s15, 4  ;;  %s17_s18 = sshll.u32 %s1206_s17, 4  ;;  %s30_s16 = int_to_ptr.vmem [resolvable:$true] %s29_s16  ;;  %s1241_s18 = int_to_ptr.vmem [resolvable:$true] %s17_s18 }
   0x4   :  { %s1111_s21 = scalar_lea.hbm %s1374_s1, 256 }
   0x5   :  { %p1112_p0 = scmp.ne.s32.totalorder %s1374_s1, %s1111_s21  ;;  %p1115_p1 = scmp.lt.u32.totalorder %s1111_s21, %s1374_s1 }
   0x7   :  { %p1117_p2 = pnand %p1115_p1, %p1112_p0 }
   0x9   :  { %1120 = shalt.err (!%p1117_p2)
}
   0xa   :  { %s1121_s26 = scalar_lea.vmem %s30_s16, 256  ;;  %p1126_p4 = scmp.lt.s32.totalorder %s30_s16, %s30_s16 }
   0xb   :  { %p1122_p3 = scmp.ne.s32.totalorder %s30_s16, %s1121_s26  ;;  %p1127_p5 = scmp.lt.s32.totalorder %s1121_s26, %s1121_s26 }
   0xd   :  { %p1128_p6 = por %p1127_p5, %p1126_p4 }
   0xf   :  { %p1129_p7 = pnand %p1128_p6, %p1122_p3 }
  0x11   :  { %1132 = shalt.err (!%p1129_p7)
}
  0x12   :  { %s1207_s27 = smov 128   ;;  %s1208_s28 = smov 8  }
  0x13   :  { %35 = dma.hbm_to_vmem [thread:$0]  %s1374_s1, 256, %s30_s16, [#allocation6], %s1207_s27, %s1207_s27, %s1208_s28  }
  0x14   :  { %s1133_s7 = scalar_lea.hbm %s1373_s0, 256 }
  0x15   :  { %p1134_p8 = scmp.ne.s32.totalorder %s1373_s0, %s1133_s7  ;;  %p1137_p9 = scmp.lt.u32.totalorder %s1133_s7, %s1373_s0 }
  0x17   :  { %p1139_p10 = pnand %p1137_p9, %p1134_p8 }
  0x19   :  { %1142 = shalt.err (!%p1139_p10)
}
  0x1a   :  { %s1143_s12 = scalar_lea.vmem %s1241_s18, 256  ;;  %p1148_p12 = scmp.lt.s32.totalorder %s1241_s18, %s1241_s18 }
  0x1b   :  { %p1144_p11 = scmp.ne.s32.totalorder %s1241_s18, %s1143_s12  ;;  %p1149_p13 = scmp.lt.s32.totalorder %s1143_s12, %s1143_s12 }
  0x1d   :  { %p1150_p0 = por %p1149_p13, %p1148_p12 }
  0x1f   :  { %p1151_p1 = pnand %p1150_p0, %p1144_p11 }
  0x21   :  { %1154 = shalt.err (!%p1151_p1)
}
  0x22   :  { %23 = dma.hbm_to_vmem [thread:$0]  %s1373_s0, 256, %s1241_s18, [#allocation3], %s1207_s27, %s1207_s27, %s1208_s28  }
  0x23   :  { %s1209_s14 = smov [#allocation7]   ;;  %s1155_s19 = scalar_lea.hbm %s1375_s2, 7680 }
  0x24   :  { %s41_s15 = sshll.u32 %s1209_s14, 4  ;;  %p1156_p2 = scmp.ne.s32.totalorder %s1375_s2, %s1155_s19  ;;  %s42_s15 = int_to_ptr.vmem [resolvable:$true] %s41_s15 }
  0x25   :  { %p1159_p3 = scmp.lt.u32.totalorder %s1155_s19, %s1375_s2 }
  0x27   :  { %p1161_p4 = pnand %p1159_p3, %p1156_p2 }
  0x29   :  { %1164 = shalt.err (!%p1161_p4)
}
  0x2a   :  { %s1165_s24 = scalar_lea.vmem %s42_s15, 7680  ;;  %p1170_p6 = scmp.lt.s32.totalorder %s42_s15, %s42_s15 }
  0x2b   :  { %p1166_p5 = scmp.ne.s32.totalorder %s42_s15, %s1165_s24  ;;  %p1171_p7 = scmp.lt.s32.totalorder %s1165_s24, %s1165_s24 }
  0x2d   :  { %p1172_p8 = por %p1171_p7, %p1170_p6 }
  0x2f   :  { %p1173_p9 = pnand %p1172_p8, %p1166_p5 }
  0x31   :  { %1176 = shalt.err (!%p1173_p9)
}
  0x32   :  { %s1210_s0 = smov 64   ;;  %s1211_s18 = smov 4  }
  0x33   :  { %47 = dma.hbm_to_vmem [thread:$0]  %s1375_s2, 7680, %s42_s15, [#allocation6], %s1210_s0, %s1210_s0, %s1211_s18  }
  0x34   :  { %1199 = dma.done.wait [#allocation3], 256  }
  0x35   :  { %1200 = vsyncadd [#allocation3], 4294967040 }
  0x36   :  { %1201 = dma.done.wait [#allocation6], 7936  }
  0x37   :  { %1202 = vsyncadd [#allocation6], 4294959360  ;;  %v1212_v0 = vmov 0   ;;  %v1213_v1 = vmov 0.0   ;;  %v1050_v2 = vld [vmem:[#allocation7] sm:$0xff]   ;;  %v1051_v3 = vld [vmem:[#allocation7 + $0x8] sm:$0xff]  }
  0x38   :  { %162 = vmatprep.subr.bf16.mxu0 %v1212_v0  ;;  %939 = vmatprep.subr.bf16.mxu1 %v1213_v1  ;;  %v1052_v4 = vld [vmem:[#allocation7 + $0x10] sm:$0xff]   ;;  %v1053_v5 = vld [vmem:[#allocation7 + $0x18] sm:$0xff]   ;;  %vm158_vm0 = vcmask 261120   ;;  %v1062_v6 = vld [vmem:[#allocation2 + $0x4] ss:$8 sps:$4 sm:$0xff]   ;;  %vm1214_vm1 = vmmov 0  }
  0x39   :  { %163 = vmatpush1.bf16.msra.mxu0 %v1050_v2  ;;  %v1063_v7 = vld [vmem:[#allocation7 + $0x50] sm:$0xff]   ;;  %v1054_v8 = vld [vmem:[#allocation7 + $0x20] sm:$0xff]   ;;  %843 = vmatprep.mubr.msk.bf16.mxu0 %vm158_vm0, %v1062_v6  ;;  %v1064_v9 = vld [vmem:[#allocation7 + $0x58] sm:$0xff]  }
  0x3a   :  { %164 = vmatprep.subr.bf16.mxu0 %v1212_v0  ;;  %940 = vmatpush3.bf16.msra.mxu1 %v1063_v7  ;;  %v1055_v10 = vld [vmem:[#allocation7 + $0x28] sm:$0xff]   ;;  %v1065_v11 = vld [vmem:[#allocation7 + $0x60] sm:$0xff]   ;;  %v1056_v12 = vld [vmem:[#allocation7 + $0x30] sm:$0xff]  }
  0x3b   :  { %941 = vmatprep.subr.bf16.mxu1 %v1213_v1  ;;  %v1066_v13 = vld [vmem:[#allocation7 + $0x68] sm:$0xff]   ;;  %v1057_v14 = vld [vmem:[#allocation7 + $0x38] sm:$0xff]   ;;  %v1067_v15 = vld [vmem:[#allocation7 + $0x70] sm:$0xff]   ;;  %955 = vmatprep.mubr.msk.bf16.mxu1 %vm1214_vm1, %v1213_v1 }
  0x3c   :  { %v1058_v16 = vld [vmem:[#allocation7 + $0x40] sm:$0xff]   ;;  %v1068_v17 = vld [vmem:[#allocation7 + $0x78] sm:$0xff]   ;;  %v1059_v18 = vld [vmem:[#allocation7 + $0x48] sm:$0xff]  }
  0x3d   :  { %165 = vmatpush1.bf16.msra.mxu0 %v1051_v3  ;;  %v1060_v19 = vld [vmem:[#allocation2] ss:$8 sps:$4 sm:$0xff]   ;;  %v1073_v34 = vld [vmem:[#allocation7 + $0xb0] sm:$0xff]   ;;  %v1074_v35 = vld [vmem:[#allocation7 + $0xb8] sm:$0xff]  }
  0x3e   :  { %166 = vmatprep.subr.bf16.mxu0 %v1212_v0  ;;  %942 = vmatpush3.bf16.msra.mxu1 %v1064_v9  ;;  %v1069_v20 = vld [vmem:[#allocation7 + $0x80] sm:$0xff]   ;;  %v1070_v21 = vld [vmem:[#allocation7 + $0x88] sm:$0xff]   ;;  %v1077_v38 = vld [vmem:[#allocation7 + $0xd0] sm:$0xff]  }
  0x3f   :  { %943 = vmatprep.subr.bf16.mxu1 %v1213_v1  ;;  %v830_v22 = vld [vmem:[%s1376_s3] ss:$0 sm:$0xff]  ;;  %v1072_v33 = vld [vmem:[#allocation7 + $0xa8] sm:$0xff]   ;;  %v1078_v39 = vld [vmem:[#allocation7 + $0xd8] sm:$0xff]  }
  0x40   :  { %v1071_v31 = vld [vmem:[#allocation7 + $0xa0] sm:$0xff]   ;;  %v1076_v37 = vld [vmem:[#allocation7 + $0xc8] sm:$0xff]   ;;  %v1079_v40 = vld [vmem:[#allocation7 + $0xf0] sm:$0xff]  }
  0x41   :  { %167 = vmatpush1.bf16.msra.mxu0 %v1052_v4  ;;  %v1075_v36 = vld [vmem:[#allocation7 + $0xc0] sm:$0xff]   ;;  %v1080_v41 = vld [vmem:[#allocation7 + $0xf8] sm:$0xff]   ;;  %v1082_v43 = vld [vmem:[#allocation7 + $0x108] sm:$0xff]  }
  0x42   :  { %168 = vmatprep.subr.bf16.mxu0 %v1212_v0  ;;  %944 = vmatpush3.bf16.msra.mxu1 %v1065_v11  ;;  %v1081_v42 = vld [vmem:[#allocation7 + $0x100] sm:$0xff]   ;;  %v1083_v44 = vld [vmem:[#allocation7 + $0x110] sm:$0xff]   ;;  %v1084_v45 = vld [vmem:[#allocation7 + $0x118] sm:$0xff]  }
  0x43   :  { %945 = vmatprep.subr.bf16.mxu1 %v1213_v1  ;;  %v845_v46 = vld [vmem:[%s1376_s3 + $0x1] ss:$0 sm:$0xff]  ;;  %v1086_v57 = vld [vmem:[#allocation7 + $0x128] sm:$0xff]   ;;  %v1089_v60 = vld [vmem:[#allocation7 + $0x150] sm:$0xff]  }
  0x44   :  { %v1085_v56 = vld [vmem:[#allocation7 + $0x120] sm:$0xff]   ;;  %v1088_v59 = vld [vmem:[#allocation7 + $0x148] sm:$0xff]   ;;  %v1090_v61 = vld [vmem:[#allocation7 + $0x158] sm:$0xff]  }
  0x45   :  { %169 = vmatpush1.bf16.msra.mxu0 %v1053_v5  ;;  %v1087_v58 = vld [vmem:[#allocation7 + $0x140] sm:$0xff]   ;;  %v1092_v63 = vld [vmem:[#allocation7 + $0x168] sm:$0xff]   ;;  %v1093_v11 = vld [vmem:[#allocation7 + $0x170] sm:$0xff]  }
  0x46   :  { %170 = vmatprep.subr.bf16.mxu0 %v1212_v0  ;;  %946 = vmatpush3.bf16.msra.mxu1 %v1066_v13  ;;  %v1091_v62 = vld [vmem:[#allocation7 + $0x160] sm:$0xff]   ;;  %v1095_v13 = vld [vmem:[#allocation7 + $0x190] sm:$0xff]  }
  0x47   :  { %947 = vmatprep.subr.bf16.mxu1 %v1213_v1 }
  0x49   :  { %171 = vmatpush1.bf16.msra.mxu0 %v1054_v8 }
  0x4a   :  { %172 = vmatprep.subr.bf16.mxu0 %v1212_v0  ;;  %948 = vmatpush3.bf16.msra.mxu1 %v1067_v15  ;;  %v1097_v15 = vld [vmem:[#allocation7 + $0x1a0] sm:$0xff]  }
  0x4b   :  { %949 = vmatprep.subr.bf16.mxu1 %v1213_v1 }
  0x4d   :  { %173 = vmatpush1.bf16.msra.mxu0 %v1055_v10 }
  0x4e   :  { %174 = vmatprep.subr.bf16.mxu0 %v1212_v0  ;;  %950 = vmatpush3.bf16.msra.mxu1 %v1068_v17  ;;  %v1099_v17 = vld [vmem:[#allocation7 + $0x1b0] sm:$0xff]  }
  0x4f   :  { %951 = vmatprep.subr.bf16.mxu1 %v1213_v1 }
  0x51   :  { %175 = vmatpush1.bf16.msra.mxu0 %v1056_v12  ;;  %v1094_v12 = vld [vmem:[#allocation7 + $0x178] sm:$0xff]  }
  0x52   :  { %176 = vmatprep.subr.bf16.mxu0 %v1212_v0  ;;  %952 = vmatpush3.bf16.msra.mxu1 %v1069_v20 }
  0x53   :  { %953 = vmatprep.subr.bf16.mxu1 %v1213_v1 }
  0x55   :  { %177 = vmatpush1.bf16.msra.mxu0 %v1057_v14  ;;  %v1096_v14 = vld [vmem:[#allocation7 + $0x198] sm:$0xff]  }
  0x56   :  { %178 = vmatprep.subr.bf16.mxu0 %v1212_v0  ;;  %954 = vmatpush3.bf16.msra.mxu1 %v1070_v21 }
  0x57   :  { %959 = vmatprep.subr.bf16.mxu1 %v1213_v1 }
  0x59   :  { %179 = vmatpush1.bf16.msra.mxu0 %v1058_v16  ;;  %v1098_v16 = vld [vmem:[#allocation7 + $0x1a8] sm:$0xff]  }
  0x5a   :  { %180 = vmatprep.subr.bf16.mxu0 %v1212_v0  ;;  %v855_v0 = vld [vmem:[%s1376_s3 + $0x2] ss:$0 sm:$0xff] }
  0x5d   :  { %181 = vmatpush1.bf16.msra.mxu0 %v1059_v18  ;;  %v1100_v18 = vld [vmem:[#allocation7 + $0x1b8] sm:$0xff]  }
  0x5e   :  { %979 = vmatprep.subr.bf16.mxu0 %v1213_v1 }
  0x60   :  { %195 = vmatmul.mubr.bf16.vlgmr.msra.gmra.mrb[0].mxu0 %v1060_v19  ;;  %v865_v19 = vld [vmem:[%s1376_s3 + $0x3] ss:$0 sm:$0xff] }
  0x61   :  { %995 = vmatprep.mubr.msk.bf16.mxu0 %vm1214_vm1, %v1213_v1  ;;  %980 = vmatpush3.bf16.msra.mxu0 %v1079_v40 }
  0x62   :  { %981 = vmatprep.subr.bf16.mxu0 %v1213_v1 }
  0x65   :  { %982 = vmatpush3.bf16.msra.mxu0 %v1080_v41 }
  0x66   :  { %983 = vmatprep.subr.bf16.mxu0 %v1213_v1 }
  0x69   :  { %984 = vmatpush3.bf16.msra.mxu0 %v1081_v42  ;;  %v788_v42 = vld [vmem:[#allocation5] sm:$0xff] }
  0x6a   :  { %985 = vmatprep.subr.bf16.mxu0 %v1213_v1 }
  0x6d   :  { %986 = vmatpush3.bf16.msra.mxu0 %v1082_v43 }
  0x6e   :  { %987 = vmatprep.subr.bf16.mxu0 %v1213_v1 }
  0x71   :  { %988 = vmatpush3.bf16.msra.mxu0 %v1083_v44 }
  0x72   :  { %989 = vmatprep.subr.bf16.mxu0 %v1213_v1 }
  0x75   :  { %990 = vmatpush3.bf16.msra.mxu0 %v1084_v45 }
  0x76   :  { %991 = vmatprep.subr.bf16.mxu0 %v1213_v1 }
  0x79   :  { %992 = vmatpush3.bf16.msra.mxu0 %v1085_v56 }
  0x7a   :  { %993 = vmatprep.subr.bf16.mxu0 %v1213_v1 }
  0x7d   :  { %994 = vmatpush3.bf16.msra.mxu0 %v1086_v57 }
  0x7e   :  { %1019 = vmatprep.subr.bf16.mxu0 %v1213_v1 }
 0x133   :  { %v196_v23 = vpop.f32.mrb[0].mxu0 }
 0x134   :  { %v197_v24 = vadd.f32 %v830_v22, %v196_v23  ;;  %v198_v25 = vpop.f32.mrb[1].mxu0 }
 0x135   :  { %v199_v26 = vpop.f32.mrb[2].mxu0 }
 0x136   :  { %v200_v27 = vadd.f32 %v830_v22, %v199_v26  ;;  %v201_v28 = vpop.f32.mrb[3].mxu0  ;;  %v203_v29 = vmax.f32 %v197_v24, 0.0 }
 0x138   :  { %v204_v30 = vmax.f32 %v200_v27, 0.0 }
 0x13a   :  { %v222_v32 = vpack.c.bf16 %v204_v30, %v203_v29  ;;  %v1101_v29 = vld [vmem:[#allocation7 + $0x1c0] sm:$0xff]   ;;  %v1102_v30 = vld [vmem:[#allocation7 + $0x1c8] sm:$0xff]  }
 0x13c   :  { %956 = vmatmul.mubr.bf16.vlgmr.msra.gmra.mrb[0].mxu1 %v222_v32 }
 0x13d   :  { %960 = vmatpush3.bf16.msra.mxu1 %v1071_v31  ;;  %975 = vmatprep.mubr.msk.bf16.mxu1 %vm1214_vm1, %v1213_v1  ;;  %v875_v31 = vld [vmem:[%s1376_s3 + $0x4] ss:$0 sm:$0xff] }
 0x13e   :  { %961 = vmatprep.subr.bf16.mxu1 %v1213_v1 }
 0x141   :  { %962 = vmatpush3.bf16.msra.mxu1 %v1072_v33 }
 0x142   :  { %963 = vmatprep.subr.bf16.mxu1 %v1213_v1 }
 0x145   :  { %964 = vmatpush3.bf16.msra.mxu1 %v1073_v34 }
 0x146   :  { %965 = vmatprep.subr.bf16.mxu1 %v1213_v1 }
 0x149   :  { %966 = vmatpush3.bf16.msra.mxu1 %v1074_v35 }
 0x14a   :  { %967 = vmatprep.subr.bf16.mxu1 %v1213_v1 }
 0x14d   :  { %968 = vmatpush3.bf16.msra.mxu1 %v1075_v36 }
 0x14e   :  { %969 = vmatprep.subr.bf16.mxu1 %v1213_v1 }
 0x151   :  { %970 = vmatpush3.bf16.msra.mxu1 %v1076_v37 }
 0x152   :  { %971 = vmatprep.subr.bf16.mxu1 %v1213_v1 }
 0x155   :  { %972 = vmatpush3.bf16.msra.mxu1 %v1077_v38 }
 0x156   :  { %973 = vmatprep.subr.bf16.mxu1 %v1213_v1 }
 0x159   :  { %974 = vmatpush3.bf16.msra.mxu1 %v1078_v39 }
 0x15a   :  { %999 = vmatprep.subr.bf16.mxu1 %v1213_v1 }
 0x20f   :  { %v313_v47 = vpop.f32.mrb[0].mxu1 }
 0x210   :  { %v314_v48 = vadd.f32 %v845_v46, %v313_v47  ;;  %v957_v49 = vpop.f32.mrb[1].mxu1 }
 0x211   :  { %v316_v50 = vpop.f32.mrb[2].mxu1  ;;  %v789_v49 = vld [vmem:[#allocation5 + $0x8] sm:$0xff] }
 0x212   :  { %v317_v51 = vadd.f32 %v845_v46, %v316_v50  ;;  %v958_v52 = vpop.f32.mrb[3].mxu1  ;;  %v320_v53 = vmax.f32 %v314_v48, 0.0 }
 0x214   :  { %v321_v54 = vmax.f32 %v317_v51, 0.0 }
 0x216   :  { %v339_v55 = vpack.c.bf16 %v321_v54, %v320_v53 }
 0x218   :  { %976 = vmatmul.mubr.bf16.vlgmr.msra.gmra.mrb[4].mxu1 %v339_v55 }
 0x219   :  { %1015 = vmatprep.mubr.msk.bf16.mxu1 %vm1214_vm1, %v1213_v1  ;;  %1000 = vmatpush3.bf16.msra.mxu1 %v1087_v58 }
 0x21a   :  { %1001 = vmatprep.subr.bf16.mxu1 %v1213_v1 }
 0x21d   :  { %1002 = vmatpush3.bf16.msra.mxu1 %v1088_v59 }
 0x21e   :  { %1003 = vmatprep.subr.bf16.mxu1 %v1213_v1 }
 0x221   :  { %1004 = vmatpush3.bf16.msra.mxu1 %v1089_v60 }
 0x222   :  { %1005 = vmatprep.subr.bf16.mxu1 %v1213_v1 }
 0x225   :  { %1006 = vmatpush3.bf16.msra.mxu1 %v1090_v61 }
 0x226   :  { %1007 = vmatprep.subr.bf16.mxu1 %v1213_v1 }
 0x229   :  { %1008 = vmatpush3.bf16.msra.mxu1 %v1091_v62 }
 0x22a   :  { %1009 = vmatprep.subr.bf16.mxu1 %v1213_v1 }
 0x22d   :  { %1010 = vmatpush3.bf16.msra.mxu1 %v1092_v63 }
 0x22e   :  { %1011 = vmatprep.subr.bf16.mxu1 %v1213_v1 }
 0x231   :  { %1012 = vmatpush3.bf16.msra.mxu1 %v1093_v11 }
 0x232   :  { %1013 = vmatprep.subr.bf16.mxu1 %v1213_v1 }
 0x235   :  { %1014 = vmatpush3.bf16.msra.mxu1 %v1094_v12 }
 0x2eb   :  { %v430_v2 = vpop.f32.mrb[4].mxu1 }
 0x2ec   :  { %v431_v3 = vadd.f32 %v855_v0, %v430_v2  ;;  %v977_v4 = vpop.f32.mrb[5].mxu1 }
 0x2ed   :  { %v433_v5 = vpop.f32.mrb[6].mxu1 }
 0x2ee   :  { %v434_v6 = vadd.f32 %v855_v0, %v433_v5  ;;  %v978_v7 = vpop.f32.mrb[7].mxu1  ;;  %v437_v8 = vmax.f32 %v431_v3, 0.0 }
 0x2f0   :  { %v438_v9 = vmax.f32 %v434_v6, 0.0 }
 0x2f2   :  { %v456_v10 = vpack.c.bf16 %v438_v9, %v437_v8 }
 0x2f4   :  { %996 = vmatmul.mubr.bf16.vlgmr.msra.gmra.mrb[4].mxu0 %v456_v10 }
 0x2f5   :  { %1035 = vmatprep.mubr.msk.bf16.mxu0 %vm1214_vm1, %v1213_v1  ;;  %1020 = vmatpush3.bf16.msra.mxu0 %v1095_v13 }
 0x2f6   :  { %1021 = vmatprep.subr.bf16.mxu0 %v1213_v1 }
 0x2f9   :  { %1022 = vmatpush3.bf16.msra.mxu0 %v1096_v14 }
 0x2fa   :  { %1023 = vmatprep.subr.bf16.mxu0 %v1213_v1 }
 0x2fd   :  { %1024 = vmatpush3.bf16.msra.mxu0 %v1097_v15 }
 0x2fe   :  { %1025 = vmatprep.subr.bf16.mxu0 %v1213_v1 }
 0x301   :  { %1026 = vmatpush3.bf16.msra.mxu0 %v1098_v16 }
 0x302   :  { %1027 = vmatprep.subr.bf16.mxu0 %v1213_v1 }
 0x305   :  { %1028 = vmatpush3.bf16.msra.mxu0 %v1099_v17 }
 0x306   :  { %1029 = vmatprep.subr.bf16.mxu0 %v1213_v1 }
 0x309   :  { %1030 = vmatpush3.bf16.msra.mxu0 %v1100_v18 }
 0x30a   :  { %1031 = vmatprep.subr.bf16.mxu0 %v1213_v1 }
 0x30d   :  { %1032 = vmatpush3.bf16.msra.mxu0 %v1101_v29 }
 0x30e   :  { %1033 = vmatprep.subr.bf16.mxu0 %v1213_v1  ;;  %v885_v1 = vld [vmem:[%s1376_s3 + $0x5] ss:$0 sm:$0xff]  ;;  %s1215_s3 = smov [#allocation8]  }
 0x30f   :  { %s817_s13 = sshll.u32 %s1215_s3, 4  ;;  %s818_s13 = int_to_ptr.vmem [resolvable:$true] %s817_s13 }
 0x310   :  { %s1177_s14 = scalar_lea.vmem %s818_s13, 256  ;;  %p1182_p11 = scmp.lt.s32.totalorder %s818_s13, %s818_s13 }
 0x311   :  { %1034 = vmatpush3.bf16.msra.mxu0 %v1102_v30  ;;  %p1178_p10 = scmp.ne.s32.totalorder %s818_s13, %s1177_s14  ;;  %p1183_p12 = scmp.lt.s32.totalorder %s1177_s14, %s1177_s14 }
 0x313   :  { %p1184_p13 = por %p1183_p12, %p1182_p11 }
 0x315   :  { %p1185_p0 = pnand %p1184_p13, %p1178_p10 }
 0x3c7   :  { %v547_v20 = vpop.f32.mrb[4].mxu0 }
 0x3c8   :  { %v548_v21 = vadd.f32 %v865_v19, %v547_v20  ;;  %v997_v22 = vpop.f32.mrb[5].mxu0 }
 0x3c9   :  { %v550_v23 = vpop.f32.mrb[6].mxu0 }
 0x3ca   :  { %v551_v24 = vadd.f32 %v865_v19, %v550_v23  ;;  %v998_v25 = vpop.f32.mrb[7].mxu0  ;;  %v554_v26 = vmax.f32 %v548_v21, 0.0 }
 0x3cc   :  { %v555_v27 = vmax.f32 %v551_v24, 0.0 }
 0x3ce   :  { %v573_v28 = vpack.c.bf16 %v555_v27, %v554_v26 }
 0x3d0   :  { %1016 = vmatmul.mubr.bf16.vlgmr.msra.gmra.mrb[8].mxu1 %v573_v28 }
 0x4a3   :  { %v664_v32 = vpop.f32.mrb[8].mxu1 }
 0x4a4   :  { %v665_v33 = vadd.f32 %v875_v31, %v664_v32  ;;  %v1017_v34 = vpop.f32.mrb[9].mxu1 }
 0x4a5   :  { %v667_v35 = vpop.f32.mrb[10].mxu1 }
 0x4a6   :  { %v668_v36 = vadd.f32 %v875_v31, %v667_v35  ;;  %v1018_v37 = vpop.f32.mrb[11].mxu1  ;;  %v671_v38 = vmax.f32 %v665_v33, 0.0 }
 0x4a8   :  { %v672_v39 = vmax.f32 %v668_v36, 0.0 }
 0x4aa   :  { %v690_v40 = vpack.c.bf16 %v672_v39, %v671_v38 }
 0x4ac   :  { %1036 = vmatmul.mubr.bf16.vlgmr.msra.gmra.mrb[8].mxu0 %v690_v40 }
 0x57f   :  { %v781_v41 = vpop.f32.mrb[8].mxu0 }
 0x580   :  { %v782_v43 = vadd.f32 %v885_v1, %v781_v41  ;;  %v1037_v44 = vpop.f32.mrb[9].mxu0 }
 0x581   :  { %v784_v45 = vpop.f32.mrb[10].mxu0 }
 0x582   :  { %v785_v46 = vadd.f32 %v885_v1, %v784_v45  ;;  %v1038_v47 = vpop.f32.mrb[11].mxu0  ;;  %v790_v48 = vadd.f32 %v788_v42, %v782_v43 }
 0x584   :  { %792 = vmax.xlane.f32.xlu0 %v790_v48  ;;  %v791_v50 = vadd.f32 %v789_v49, %v785_v46 }
 0x588   :  { %794 = vmax.xlane.f32.xlu0 %v791_v50 }
 0x611   :  { %v793_v51 = vpop.xlane.xlu0 %792 }
 0x612   :  { %v796_v52 = vsub.f32 %v790_v48, %v793_v51 }
 0x614   :  { %v798_v53 = vmul.f32 1.442695, %v796_v52 }
 0x615   :  { %v795_v54 = vpop.xlane.xlu0 %794 }
 0x616   :  { %1103 = vpow2.f32 %v798_v53  ;;  %v797_v55 = vsub.f32 %v791_v50, %v795_v54 }
 0x618   :  { %v800_v56 = vmul.f32 1.442695, %v797_v55 }
 0x61a   :  { %1105 = vpow2.f32 %v800_v56 }
 0x620   :  { %v1104_v57 = vpop.eup %1103 }
 0x621   :  { %802 = vadd.xlane.f32.xlu1 %v1104_v57 }
 0x624   :  { %v1106_v58 = vpop.eup %1105 }
 0x625   :  { %804 = vadd.xlane.f32.xlu1 %v1106_v58 }
 0x6ae   :  { %v803_v59 = vpop.xlane.xlu1 %802 }
 0x6af   :  { %1107 = vrcp.f32 %v803_v59 }
 0x6b2   :  { %v805_v60 = vpop.xlane.xlu1 %804 }
 0x6b3   :  { %1109 = vrcp.f32 %v805_v60 }
 0x6b9   :  { %v1108_v61 = vpop.eup %1107 }
 0x6ba   :  { %v807_v62 = vmul.f32 %v1108_v61, %v1104_v57 }
 0x6bc   :  { %810 = vst [vmem:[#allocation8] sm:$0xff] %v807_v62 }
 0x6bd   :  { %v1110_v63 = vpop.eup %1109 }
 0x6be   :  { %v809_v0 = vmul.f32 %v1110_v63, %v1106_v58 }
 0x6c0   :  { %811 = vst [vmem:[#allocation8 + $0x8] sm:$0xff] %v809_v0 }
 0x6c1   :  { %1188 = shalt.err (!%p1185_p0)
}
 0x6c2   :  { %s1189_s17 = scalar_lea.hbm %s1377_s4, 256 }
 0x6c3   :  { %p1190_p1 = scmp.ne.s32.totalorder %s1377_s4, %s1189_s17  ;;  %p1193_p2 = scmp.lt.u32.totalorder %s1189_s17, %s1377_s4 }
 0x6c5   :  { %p1195_p3 = pnand %p1193_p2, %p1190_p1 }
 0x6c7   :  { %1198 = shalt.err (!%p1195_p3)
}
 0x6c8   :  { %823 = dma.vmem_to_hbm [thread:$0]  %s818_s13, 256, %s1377_s4, [#allocation4], %s1207_s27, %s1207_s27, %s1208_s28  }
 0x6c9   :  { %1203 = dma.done.wait [#allocation4], 256  }
 0x6ca   :  { %1204 = vsyncadd [#allocation4], 4294967040 }
 0x6cb   :  { %827 = vsyncpa [#allocation3], 1 }
 0x6cc   :  { %828 = vsyncpa [#allocation6], 1 }
 0x6cd   :  { %829 = vsyncpa [#allocation4], 1 }

</bundles_post_ra>
